<compile_context>
chip_gen: v6e
topology: v6e:2x2x1
jax: 0.10.0
libtpu: 0.0.40
codegen_flags: <defaults>
</compile_context>

<pallas_src>
import jax
import jax.numpy as jnp
from jax.experimental import pallas as pl
from jax.experimental.pallas import tpu as pltpu


LANE = 128       # feature dims padded to lane width (dense matmuls / stores)
MIN_TB = 128     # MXU-aligned tile floor for large batches
MAX_TB_DEFAULT = 512   # amortizes ~0.35us/step overhead against v6e/v7x HBM


def _round_up(n, m):
    return ((n + m - 1) // m) * m


def _tpu_generation_params():
    """(tensorcores_per_chip, max_batch_tile). v7x has 2 TCs; v5e caps TB at 256."""
    num_tc, max_tb = 1, MAX_TB_DEFAULT
    try:
        kind = jax.devices()[0].device_kind.lower()
        if "v7" in kind:
            num_tc = 2
        if "v5" in kind:
            max_tb = 256           # 128 rows already fill the v5e 4x128x128 MXU
    except Exception:
        pass
    return num_tc, max_tb


def _vmem_capacity_bytes():
    try:
        return int(pltpu.get_tpu_info().vmem_capacity_bytes)
    except Exception:
        return 64 << 20            # conservative default: v7x per-TC VMEM


def mlp2nn_kernel(x_ref, w1_ref, b1_ref, w2_ref, b2_ref, w3_ref, b3_ref, o_ref):
    # x tile (TB, K_pad) bf16; weights bf16 (VMEM-resident), biases f32; out f32.
    x = x_ref[...]
    h1 = jnp.dot(x, w1_ref[...], preferred_element_type=jnp.float32) + b1_ref[...]
    h1 = jnp.maximum(h1, 0.0).astype(jnp.bfloat16)
    h2 = jnp.dot(h1, w2_ref[...], preferred_element_type=jnp.float32) + b2_ref[...]
    h2 = jnp.maximum(h2, 0.0).astype(jnp.bfloat16)
    y = jnp.dot(h2, w3_ref[...], preferred_element_type=jnp.float32) + b3_ref[...]
    o_ref[...] = y.astype(o_ref.dtype)


def init_params(key, dim_in, dim_hidden, dim_out):
    """nn.Linear-style uniform init; weights stored (in, out), fp32 logical params."""
    ks = jax.random.split(key, 6)

    def linear(kw, kb, fan_in, fan_out):
        bound = 1.0 / jnp.sqrt(fan_in)
        w = jax.random.uniform(kw, (fan_in, fan_out), jnp.float32, -bound, bound)
        b = jax.random.uniform(kb, (fan_out,), jnp.float32, -bound, bound)
        return w, b

    w1, b1 = linear(ks[0], ks[1], dim_in, dim_hidden)
    w2, b2 = linear(ks[2], ks[3], dim_hidden, dim_hidden)
    w3, b3 = linear(ks[4], ks[5], dim_hidden, dim_out)
    return (w1, b1, w2, b2, w3, b3)


def pack_params(params, dim_in, dim_hidden, dim_out):
    """Zero-pad to lane-dense (multiple-of-128) dims; weights -> bf16, biases -> (1, n) f32."""
    w1, b1, w2, b2, w3, b3 = params
    k_pad = _round_up(dim_in, LANE)
    h_pad = _round_up(dim_hidden, LANE)
    o_pad = _round_up(dim_out, LANE)

    def pad_w(w, r, c):
        return jnp.pad(w, ((0, r - w.shape[0]), (0, c - w.shape[1]))).astype(jnp.bfloat16)

    def pad_b(b, c):
        return jnp.pad(b.reshape(1, -1), ((0, 0), (0, c - b.shape[-1]))).astype(jnp.float32)

    return (
        pad_w(w1, k_pad, h_pad), pad_b(b1, h_pad),
        pad_w(w2, h_pad, h_pad), pad_b(b2, h_pad),
        pad_w(w3, h_pad, o_pad), pad_b(b3, o_pad),
    )


def _choose_tb(B, num_tc, max_tb):
    """Batch tile: multiple of 16 (bf16 packs 16 rows/vreg), 128-aligned when
    large (MXU-friendly), and >= num_tc grid steps on multi-TC chips."""
    b16 = _round_up(B, 16)
    tb = _round_up(pl.cdiv(b16, max(num_tc, 1)), 16)
    if tb > MIN_TB:
        tb = _round_up(tb, MIN_TB)
    return min(tb, max_tb, b16)


def mlp2nn_forward(x, packed_params, dim_out):
    """x: (B, C, H, W) or (B, dim_in). Returns (B, dim_out) f32."""
    w1, b1, w2, b2, w3, b3 = packed_params
    k_pad, h_pad = w1.shape
    o_pad = w3.shape[1]

    B = x.shape[0]
    # Cast to bf16 *before* padding: single wrapper-side pass, half the HBM bytes.
    x2d = x.reshape(B, -1).astype(jnp.bfloat16)     # torch: x.view(x.size(0), -1)
    dim_in = x2d.shape[1]

    # --- generation-aware tile / VMEM budgeting ---------------------------
    num_tc, max_tb = _tpu_generation_params()
    vmem_cap = _vmem_capacity_bytes()
    usable = vmem_cap - (8 << 20)        # headroom for compiler-internal scratch

    # Resident weights are single-buffered (Buffered(1)); biases stay f32.
    weight_bytes = (w1.size + w2.size + w3.size) * 2 + (b1.size + b2.size + b3.size) * 4

    def tile_bytes(tb):
        x_buf = 2 * tb * k_pad * 2               # double-buffered bf16 x tiles
        o_buf = 2 * tb * o_pad * 4               # double-buffered f32 out tiles
        interm = 2 * tb * h_pad * (4 + 2)        # f32 h1/h2 + bf16 repacks (in-kernel)
        return x_buf + o_buf + interm

    if weight_bytes > usable:
        # TODO(synk): add a K-tiled fc1 path (grid axis over k_pad with an f32
        # accumulator scratch) when bf16 weights exceed per-core VMEM.
        raise ValueError("MLP_2NN weights exceed per-core VMEM; K-tiling not implemented")

    TB = _choose_tb(B, num_tc, max_tb)
    while TB > 16 and weight_bytes + tile_bytes(TB) > usable:
        TB = max(16, _round_up(TB // 2, 16))

    B_pad = _round_up(B, TB)
    grid = (B_pad // TB,)

    if B_pad != B or dim_in != k_pad:
        x2d = jnp.pad(x2d, ((0, B_pad - B), (0, k_pad - dim_in)))

    need = weight_bytes + tile_bytes(TB)
    vmem_limit = int(min(vmem_cap - (2 << 20), max(int(1.5 * need), 8 << 20)))

    flops = 2 * B_pad * (k_pad * h_pad + h_pad * h_pad + h_pad * o_pad)
    bytes_accessed = x2d.size * 2 + weight_bytes + B_pad * o_pad * 4

    def run(single_buffer_weights):
        # Constant index_maps -> weights never change across grid steps; keep a
        # single VMEM buffer for them instead of the default double buffer.
        wkw = {"pipeline_mode": pl.Buffered(1)} if single_buffer_weights else {}
        in_specs = [
            pl.BlockSpec((TB, k_pad), lambda i: (i, 0)),            # x: batch-tiled, double-buffered
            pl.BlockSpec((k_pad, h_pad), lambda i: (0, 0), **wkw),  # w1: VMEM-resident
            pl.BlockSpec((1, h_pad), lambda i: (0, 0), **wkw),      # b1
            pl.BlockSpec((h_pad, h_pad), lambda i: (0, 0), **wkw),  # w2
            pl.BlockSpec((1, h_pad), lambda i: (0, 0), **wkw),      # b2
            pl.BlockSpec((h_pad, o_pad), lambda i: (0, 0), **wkw),  # w3
            pl.BlockSpec((1, o_pad), lambda i: (0, 0), **wkw),      # b3
        ]
        out = pl.pallas_call(
            mlp2nn_kernel,
            out_shape=jax.ShapeDtypeStruct((B_pad, o_pad), jnp.float32),
            grid=grid,
            in_specs=in_specs,
            # f32 writeback over a lane-dense (128-multiple) padded width; kept
            # f32 to match torch fp32 output semantics downstream.
            out_specs=pl.BlockSpec((TB, o_pad), lambda i: (i, 0)),
            compiler_params=pltpu.CompilerParams(
                dimension_semantics=("parallel",),
                vmem_limit_bytes=vmem_limit,
            ),
            cost_estimate=pl.CostEstimate(
                flops=flops, bytes_accessed=bytes_accessed, transcendentals=0),
        )(x2d, w1, b1, w2, b2, w3, b3)
        return jax.block_until_ready(out)

    try:
        out = run(single_buffer_weights=True)
    except Exception:
        # Fallback for builds where BlockSpec pipeline_mode=Buffered(1) is not
        # supported on the pallas_call path.
        out = run(single_buffer_weights=False)

    return out[:B, :dim_out]


def reference_forward(x, params, bf16_inputs=False):
    w1, b1, w2, b2, w3, b3 = params
    x2d = x.reshape(x.shape[0], -1)
    cast = (lambda a: a.astype(jnp.bfloat16)) if bf16_inputs else (lambda a: a)
    dot = lambda a, b: jnp.dot(cast(a), cast(b), preferred_element_type=jnp.float32)
    h1 = jax.nn.relu(dot(x2d, w1) + b1)
    h2 = jax.nn.relu(dot(h1, w2) + b2)
    return dot(h2, w3) + b3


if __name__ == "__main__":
    # Small shapes consistent with the module: x is (B, C, H, W) flattened to dim_in.
    B, C, H, W = 2, 4, 16, 16
    dim_in, dim_hidden, dim_out = C * H * W, 32, 8

    key = jax.random.PRNGKey(0)
    kx, kp = jax.random.split(key)
    x = jax.random.normal(kx, (B, C, H, W), dtype=jnp.float32)

    params = init_params(kp, dim_in, dim_hidden, dim_out)
    packed = pack_params(params, dim_in, dim_hidden, dim_out)

    out = mlp2nn_forward(x, packed, dim_out)
    out = jax.block_until_ready(out)
    assert out.shape == (B, dim_out)

    # Same arithmetic as the kernel (bf16 MXU inputs, f32 accumulation) -> tight check.
    ref_bf16 = reference_forward(x, params, bf16_inputs=True)
    assert jnp.allclose(out, ref_bf16, atol=2e-3, rtol=2e-3), "mismatch vs bf16-matched reference"

    # fp32 torch semantics (bf16 MXU inputs are a deliberate precision tradeoff;
    # this loose check holds at these small K / hidden sizes).
    ref_f32 = reference_forward(x, params, bf16_inputs=False)
    assert jnp.allclose(out, ref_f32, atol=5e-2, rtol=5e-2), "mismatch vs fp32 reference"

    print("KERNEL_OK")
</pallas_src>

<mosaic_0001>
module attributes {stable_mosaic.version = 11 : i64} {
  func.func @mlp2nn_kernel(%arg0: i32, %arg1: memref<16x1024xbf16, #tpu.memory_space<vmem>>, %arg2: memref<1024x128xbf16, #tpu.memory_space<vmem>>, %arg3: memref<1x128xf32, #tpu.memory_space<vmem>>, %arg4: memref<128x128xbf16, #tpu.memory_space<vmem>>, %arg5: memref<1x128xf32, #tpu.memory_space<vmem>>, %arg6: memref<128x128xbf16, #tpu.memory_space<vmem>>, %arg7: memref<1x128xf32, #tpu.memory_space<vmem>>, %arg8: memref<16x128xf32, #tpu.memory_space<vmem>>) attributes {dimension_semantics = [#tpu.dimension_semantics<parallel>], iteration_bounds = array<i64: 1>, scalar_prefetch = 0 : i64, scratch_operands = 0 : i64, tpu.core_type = #tpu.core_type<tc>, window_params = [{transform_indices = @transform_0, window_bounds = array<i64: 16, 1024>}, {pipeline_mode = #tpu.pipeline_mode<synchronous>, transform_indices = @transform_1, window_bounds = array<i64: 1024, 128>}, {pipeline_mode = #tpu.pipeline_mode<synchronous>, transform_indices = @transform_2, window_bounds = array<i64: 1, 128>}, {pipeline_mode = #tpu.pipeline_mode<synchronous>, transform_indices = @transform_3, window_bounds = array<i64: 128, 128>}, {pipeline_mode = #tpu.pipeline_mode<synchronous>, transform_indices = @transform_4, window_bounds = array<i64: 1, 128>}, {pipeline_mode = #tpu.pipeline_mode<synchronous>, transform_indices = @transform_5, window_bounds = array<i64: 128, 128>}, {pipeline_mode = #tpu.pipeline_mode<synchronous>, transform_indices = @transform_6, window_bounds = array<i64: 1, 128>}, {transform_indices = @transform_7, window_bounds = array<i64: 16, 128>}]} {
    %c0 = arith.constant 0 : index
    %c0_0 = arith.constant 0 : index
    %0 = vector.load %arg1[%c0, %c0_0] : memref<16x1024xbf16, #tpu.memory_space<vmem>>, vector<16x1024xbf16>
    %c0_1 = arith.constant 0 : index
    %c0_2 = arith.constant 0 : index
    %1 = vector.load %arg2[%c0_1, %c0_2] : memref<1024x128xbf16, #tpu.memory_space<vmem>>, vector<1024x128xbf16>
    %cst = arith.constant dense<0.000000e+00> : vector<16x128xf32>
    %2 = tpu.matmul %0, %1, %cst {dimension_numbers = #tpu.dot_dimension_numbers<[1], [0], [0], [1], [0, 0, 1, 1], [], []>} : vector<16x1024xbf16>, vector<1024x128xbf16>, vector<16x128xf32> -> vector<16x128xf32>
    %c0_3 = arith.constant 0 : index
    %c0_4 = arith.constant 0 : index
    %3 = vector.load %arg3[%c0_3, %c0_4] : memref<1x128xf32, #tpu.memory_space<vmem>>, vector<1x128xf32>
    %4 = vector.broadcast %3 : vector<1x128xf32> to vector<16x128xf32>
    %5 = arith.addf %2, %4 : vector<16x128xf32>
    %cst_5 = arith.constant 0.000000e+00 : f32
    %6 = vector.broadcast %cst_5 : f32 to vector<16x128xf32>
    %7 = arith.maximumf %5, %6 : vector<16x128xf32>
    %8 = arith.truncf %7 : vector<16x128xf32> to vector<16x128xbf16>
    %c0_6 = arith.constant 0 : index
    %c0_7 = arith.constant 0 : index
    %9 = vector.load %arg4[%c0_6, %c0_7] : memref<128x128xbf16, #tpu.memory_space<vmem>>, vector<128x128xbf16>
    %cst_8 = arith.constant dense<0.000000e+00> : vector<16x128xf32>
    %10 = tpu.matmul %8, %9, %cst_8 {dimension_numbers = #tpu.dot_dimension_numbers<[1], [0], [0], [1], [0, 0, 1, 1], [], []>} : vector<16x128xbf16>, vector<128x128xbf16>, vector<16x128xf32> -> vector<16x128xf32>
    %c0_9 = arith.constant 0 : index
    %c0_10 = arith.constant 0 : index
    %11 = vector.load %arg5[%c0_9, %c0_10] : memref<1x128xf32, #tpu.memory_space<vmem>>, vector<1x128xf32>
    %12 = vector.broadcast %11 : vector<1x128xf32> to vector<16x128xf32>
    %13 = arith.addf %10, %12 : vector<16x128xf32>
    %cst_11 = arith.constant 0.000000e+00 : f32
    %14 = vector.broadcast %cst_11 : f32 to vector<16x128xf32>
    %15 = arith.maximumf %13, %14 : vector<16x128xf32>
    %16 = arith.truncf %15 : vector<16x128xf32> to vector<16x128xbf16>
    %c0_12 = arith.constant 0 : index
    %c0_13 = arith.constant 0 : index
    %17 = vector.load %arg6[%c0_12, %c0_13] : memref<128x128xbf16, #tpu.memory_space<vmem>>, vector<128x128xbf16>
    %cst_14 = arith.constant dense<0.000000e+00> : vector<16x128xf32>
    %18 = tpu.matmul %16, %17, %cst_14 {dimension_numbers = #tpu.dot_dimension_numbers<[1], [0], [0], [1], [0, 0, 1, 1], [], []>} : vector<16x128xbf16>, vector<128x128xbf16>, vector<16x128xf32> -> vector<16x128xf32>
    %c0_15 = arith.constant 0 : index
    %c0_16 = arith.constant 0 : index
    %19 = vector.load %arg7[%c0_15, %c0_16] : memref<1x128xf32, #tpu.memory_space<vmem>>, vector<1x128xf32>
    %20 = vector.broadcast %19 : vector<1x128xf32> to vector<16x128xf32>
    %21 = arith.addf %18, %20 : vector<16x128xf32>
    %c0_17 = arith.constant 0 : index
    %c0_18 = arith.constant 0 : index
    %22 = vector.load %arg8[%c0_17, %c0_18] : memref<16x128xf32, #tpu.memory_space<vmem>>, vector<16x128xf32>
    tpu.vector_store %arg8[%c0_17, %c0_18], %21 {strides = array<i32>} : memref<16x128xf32, #tpu.memory_space<vmem>>, vector<16x128xf32>,
    return
  }
  func.func @transform_0(%arg0: i32) -> (i32, i32) {
    %c0_i32 = arith.constant 0 : i32
    %c0_i32_0 = arith.constant 0 : i32
    return %arg0, %c0_i32 : i32, i32
  }
  func.func @transform_1(%arg0: i32) -> (i32, i32) {
    %c0_i32 = arith.constant 0 : i32
    %c0_i32_0 = arith.constant 0 : i32
    %c0_i32_1 = arith.constant 0 : i32
    return %c0_i32, %c0_i32_0 : i32, i32
  }
  func.func @transform_2(%arg0: i32) -> (i32, i32) {
    %c0_i32 = arith.constant 0 : i32
    %c0_i32_0 = arith.constant 0 : i32
    %c0_i32_1 = arith.constant 0 : i32
    return %c0_i32, %c0_i32_0 : i32, i32
  }
  func.func @transform_3(%arg0: i32) -> (i32, i32) {
    %c0_i32 = arith.constant 0 : i32
    %c0_i32_0 = arith.constant 0 : i32
    %c0_i32_1 = arith.constant 0 : i32
    return %c0_i32, %c0_i32_0 : i32, i32
  }
  func.func @transform_4(%arg0: i32) -> (i32, i32) {
    %c0_i32 = arith.constant 0 : i32
    %c0_i32_0 = arith.constant 0 : i32
    %c0_i32_1 = arith.constant 0 : i32
    return %c0_i32, %c0_i32_0 : i32, i32
  }
  func.func @transform_5(%arg0: i32) -> (i32, i32) {
    %c0_i32 = arith.constant 0 : i32
    %c0_i32_0 = arith.constant 0 : i32
    %c0_i32_1 = arith.constant 0 : i32
    return %c0_i32, %c0_i32_0 : i32, i32
  }
  func.func @transform_6(%arg0: i32) -> (i32, i32) {
    %c0_i32 = arith.constant 0 : i32
    %c0_i32_0 = arith.constant 0 : i32
    %c0_i32_1 = arith.constant 0 : i32
    return %c0_i32, %c0_i32_0 : i32, i32
  }
  func.func @transform_7(%arg0: i32) -> (i32, i32) {
    %c0_i32 = arith.constant 0 : i32
    %c0_i32_0 = arith.constant 0 : i32
    return %arg0, %c0_i32 : i32, i32
  }
}

module attributes {stable_mosaic.version = 11 : i64} {
  func.func @mlp2nn_kernel(%arg0: i32, %arg1: memref<16x1024xbf16, #tpu.memory_space<vmem>>, %arg2: memref<1024x128xbf16, #tpu.memory_space<vmem>>, %arg3: memref<1x128xf32, #tpu.memory_space<vmem>>, %arg4: memref<128x128xbf16, #tpu.memory_space<vmem>>, %arg5: memref<1x128xf32, #tpu.memory_space<vmem>>, %arg6: memref<128x128xbf16, #tpu.memory_space<vmem>>, %arg7: memref<1x128xf32, #tpu.memory_space<vmem>>, %arg8: memref<16x128xf32, #tpu.memory_space<vmem>>) attributes {dimension_semantics = [#tpu.dimension_semantics<parallel>], iteration_bounds = array<i64: 1>, scalar_prefetch = 0 : i64, scratch_operands = 0 : i64, tpu.core_type = #tpu.core_type<tc>, window_params = [{transform_indices = @transform_0, window_bounds = array<i64: 16, 1024>}, {pipeline_mode = #tpu.pipeline_mode<synchronous>, transform_indices = @transform_1, window_bounds = array<i64: 1024, 128>}, {pipeline_mode = #tpu.pipeline_mode<synchronous>, transform_indices = @transform_2, window_bounds = array<i64: 1, 128>}, {pipeline_mode = #tpu.pipeline_mode<synchronous>, transform_indices = @transform_3, window_bounds = array<i64: 128, 128>}, {pipeline_mode = #tpu.pipeline_mode<synchronous>, transform_indices = @transform_4, window_bounds = array<i64: 1, 128>}, {pipeline_mode = #tpu.pipeline_mode<synchronous>, transform_indices = @transform_5, window_bounds = array<i64: 128, 128>}, {pipeline_mode = #tpu.pipeline_mode<synchronous>, transform_indices = @transform_6, window_bounds = array<i64: 1, 128>}, {transform_indices = @transform_7, window_bounds = array<i64: 16, 128>}]} {
    %c0 = arith.constant 0 : index
    %c0_0 = arith.constant 0 : index
    %0 = vector.load %arg1[%c0, %c0_0] : memref<16x1024xbf16, #tpu.memory_space<vmem>>, vector<16x1024xbf16>
    %c0_1 = arith.constant 0 : index
    %c0_2 = arith.constant 0 : index
    %1 = vector.load %arg2[%c0_1, %c0_2] : memref<1024x128xbf16, #tpu.memory_space<vmem>>, vector<1024x128xbf16>
    %cst = arith.constant dense<0.000000e+00> : vector<16x128xf32>
    %2 = tpu.matmul %0, %1, %cst {dimension_numbers = #tpu.dot_dimension_numbers<[1], [0], [0], [1], [0, 0, 1, 1], [], []>} : vector<16x1024xbf16>, vector<1024x128xbf16>, vector<16x128xf32> -> vector<16x128xf32>
    %c0_3 = arith.constant 0 : index
    %c0_4 = arith.constant 0 : index
    %3 = vector.load %arg3[%c0_3, %c0_4] : memref<1x128xf32, #tpu.memory_space<vmem>>, vector<1x128xf32>
    %4 = vector.broadcast %3 : vector<1x128xf32> to vector<16x128xf32>
    %5 = arith.addf %2, %4 : vector<16x128xf32>
    %cst_5 = arith.constant 0.000000e+00 : f32
    %6 = vector.broadcast %cst_5 : f32 to vector<16x128xf32>
    %7 = arith.maximumf %5, %6 : vector<16x128xf32>
    %8 = arith.truncf %7 : vector<16x128xf32> to vector<16x128xbf16>
    %c0_6 = arith.constant 0 : index
    %c0_7 = arith.constant 0 : index
    %9 = vector.load %arg4[%c0_6, %c0_7] : memref<128x128xbf16, #tpu.memory_space<vmem>>, vector<128x128xbf16>
    %cst_8 = arith.constant dense<0.000000e+00> : vector<16x128xf32>
    %10 = tpu.matmul %8, %9, %cst_8 {dimension_numbers = #tpu.dot_dimension_numbers<[1], [0], [0], [1], [0, 0, 1, 1], [], []>} : vector<16x128xbf16>, vector<128x128xbf16>, vector<16x128xf32> -> vector<16x128xf32>
    %c0_9 = arith.constant 0 : index
    %c0_10 = arith.constant 0 : index
    %11 = vector.load %arg5[%c0_9, %c0_10] : memref<1x128xf32, #tpu.memory_space<vmem>>, vector<1x128xf32>
    %12 = vector.broadcast %11 : vector<1x128xf32> to vector<16x128xf32>
    %13 = arith.addf %10, %12 : vector<16x128xf32>
    %cst_11 = arith.constant 0.000000e+00 : f32
    %14 = vector.broadcast %cst_11 : f32 to vector<16x128xf32>
    %15 = arith.maximumf %13, %14 : vector<16x128xf32>
    %16 = arith.truncf %15 : vector<16x128xf32> to vector<16x128xbf16>
    %c0_12 = arith.constant 0 : index
    %c0_13 = arith.constant 0 : index
    %17 = vector.load %arg6[%c0_12, %c0_13] : memref<128x128xbf16, #tpu.memory_space<vmem>>, vector<128x128xbf16>
    %cst_14 = arith.constant dense<0.000000e+00> : vector<16x128xf32>
    %18 = tpu.matmul %16, %17, %cst_14 {dimension_numbers = #tpu.dot_dimension_numbers<[1], [0], [0], [1], [0, 0, 1, 1], [], []>} : vector<16x128xbf16>, vector<128x128xbf16>, vector<16x128xf32> -> vector<16x128xf32>
    %c0_15 = arith.constant 0 : index
    %c0_16 = arith.constant 0 : index
    %19 = vector.load %arg7[%c0_15, %c0_16] : memref<1x128xf32, #tpu.memory_space<vmem>>, vector<1x128xf32>
    %20 = vector.broadcast %19 : vector<1x128xf32> to vector<16x128xf32>
    %21 = arith.addf %18, %20 : vector<16x128xf32>
    %c0_17 = arith.constant 0 : index
    %c0_18 = arith.constant 0 : index
    %22 = vector.load %arg8[%c0_17, %c0_18] : memref<16x128xf32, #tpu.memory_space<vmem>>, vector<16x128xf32>
    tpu.vector_store %arg8[%c0_17, %c0_18], %21 {strides = array<i32>} : memref<16x128xf32, #tpu.memory_space<vmem>>, vector<16x128xf32>,
    return
  }
  func.func @transform_0(%arg0: i32) -> (i32, i32) {
    %c0_i32 = arith.constant 0 : i32
    %c0_i32_0 = arith.constant 0 : i32
    return %arg0, %c0_i32 : i32, i32
  }
  func.func @transform_1(%arg0: i32) -> (i32, i32) {
    %c0_i32 = arith.constant 0 : i32
    %c0_i32_0 = arith.constant 0 : i32
    %c0_i32_1 = arith.constant 0 : i32
    return %c0_i32, %c0_i32_0 : i32, i32
  }
  func.func @transform_2(%arg0: i32) -> (i32, i32) {
    %c0_i32 = arith.constant 0 : i32
    %c0_i32_0 = arith.constant 0 : i32
    %c0_i32_1 = arith.constant 0 : i32
    return %c0_i32, %c0_i32_0 : i32, i32
  }
  func.func @transform_3(%arg0: i32) -> (i32, i32) {
    %c0_i32 = arith.constant 0 : i32
    %c0_i32_0 = arith.constant 0 : i32
    %c0_i32_1 = arith.constant 0 : i32
    return %c0_i32, %c0_i32_0 : i32, i32
  }
  func.func @transform_4(%arg0: i32) -> (i32, i32) {
    %c0_i32 = arith.constant 0 : i32
    %c0_i32_0 = arith.constant 0 : i32
    %c0_i32_1 = arith.constant 0 : i32
    return %c0_i32, %c0_i32_0 : i32, i32
  }
  func.func @transform_5(%arg0: i32) -> (i32, i32) {
    %c0_i32 = arith.constant 0 : i32
    %c0_i32_0 = arith.constant 0 : i32
    %c0_i32_1 = arith.constant 0 : i32
    return %c0_i32, %c0_i32_0 : i32, i32
  }
  func.func @transform_6(%arg0: i32) -> (i32, i32) {
    %c0_i32 = arith.constant 0 : i32
    %c0_i32_0 = arith.constant 0 : i32
    %c0_i32_1 = arith.constant 0 : i32
    return %c0_i32, %c0_i32_0 : i32, i32
  }
  func.func @transform_7(%arg0: i32) -> (i32, i32) {
    %c0_i32 = arith.constant 0 : i32
    %c0_i32_0 = arith.constant 0 : i32
    return %arg0, %c0_i32 : i32, i32
  }
}

</mosaic_0001>

<bundles_post_ra>
// kernel: tpu_custom_call.1
= control target key start
LH: loop header
LB: loop body
LE: loop exit
PB: predicated region body
PF: predicated region fallthrough
CT: control target
= control target key end

     0   :  { %12 = vsyncpa [#allocation3], 0  ;;  %s1607_s0 = inlined_call_operand.hbm [shape: bf16[16,1024], index: 0, kind: input, shape index: {}]   ;;  %s1608_s1 = inlined_call_operand.hbm [shape: bf16[1024,128], index: 1, kind: input, shape index: {}]   ;;  %s1609_s2 = inlined_call_operand.vmem [shape: f32[1,128], index: 2, kind: input, shape index: {}]   ;;  %s1610_s3 = inlined_call_operand.hbm [shape: bf16[128,128], index: 3, kind: input, shape index: {}]   ;;  %s1611_s4 = inlined_call_operand.vmem [shape: f32[1,128], index: 4, kind: input, shape index: {}]   ;;  %s1612_s5 = inlined_call_operand.hbm [shape: bf16[128,128], index: 5, kind: input, shape index: {}]   ;;  %s1613_s6 = inlined_call_operand.vmem [shape: f32[1,128], index: 6, kind: input, shape index: {}]   ;;  %s1614_s7 = inlined_call_operand.hbm [shape: f32[16,128], index: 7, kind: output, shape index: {}]  }
   0x1   :  { %13 = vsyncpa [#allocation6], 0 }
   0x2   :  { %14 = vsyncpa [#allocation9], 0 }
   0x3   :  { %15 = vsyncpa [#allocation4], 0  ;;  %s1503_s24 = smov [#allocation5]  }
   0x4   :  { %s33_s25 = sshll.u32 %s1503_s24, 4  ;;  %s34_s25 = int_to_ptr.vmem [resolvable:$true] %s33_s25 }
   0x5   :  { %s1403_s26 = scalar_lea.vmem %s34_s25, 8192  ;;  %p1408_p1 = scmp.lt.s32.totalorder %s34_s25, %s34_s25 }
   0x6   :  { %p1404_p0 = scmp.ne.s32.totalorder %s34_s25, %s1403_s26  ;;  %p1409_p2 = scmp.lt.s32.totalorder %s1403_s26, %s1403_s26 }
   0x8   :  { %p1410_p3 = por %p1409_p2, %p1408_p1 }
   0xa   :  { %p1411_p4 = pnand %p1410_p3, %p1404_p0 }
   0xc   :  { %1414 = shalt.err (!%p1411_p4)
}
   0xd   :  { %s1504_s27 = smov 64   ;;  %s1505_s28 = smov 4  }
   0xe   :  { %39 = dma.hbm_to_vmem [thread:$0]  %s1608_s1, 8192, %s34_s25, [#allocation6], %s1504_s27, %s1504_s27, %s1505_s28  }
   0xf   :  { %s1506_s8 = smov [#allocation2]  }
  0x10   :  { %s21_s9 = sshll.u32 %s1506_s8, 4  ;;  %s22_s9 = int_to_ptr.vmem [resolvable:$true] %s21_s9 }
  0x11   :  { %s1423_s10 = scalar_lea.vmem %s22_s9, 1024  ;;  %p1428_p6 = scmp.lt.s32.totalorder %s22_s9, %s22_s9 }
  0x12   :  { %p1424_p5 = scmp.ne.s32.totalorder %s22_s9, %s1423_s10  ;;  %p1429_p7 = scmp.lt.s32.totalorder %s1423_s10, %s1423_s10 }
  0x14   :  { %p1430_p8 = por %p1429_p7, %p1428_p6 }
  0x16   :  { %p1431_p9 = pnand %p1430_p8, %p1424_p5 }
  0x18   :  { %1434 = shalt.err (!%p1431_p9)
}
  0x19   :  { %s1507_s11 = smov 512   ;;  %s1508_s12 = smov 32  }
  0x1a   :  { %27 = dma.hbm_to_vmem [thread:$0]  %s1607_s0, 1024, %s22_s9, [#allocation3], %s1507_s11, %s1507_s11, %s1508_s12  }
  0x1b   :  { %s1509_s15 = smov [#allocation7]   ;;  %s1510_s17 = smov [#allocation8]  }
  0x1c   :  { %s47_s16 = sshll.u32 %s1509_s15, 4  ;;  %s61_s1 = sshll.u32 %s1510_s17, 4  ;;  %s48_s16 = int_to_ptr.vmem [resolvable:$true] %s47_s16  ;;  %s62_s1 = int_to_ptr.vmem [resolvable:$true] %s61_s1 }
  0x1d   :  { %s1443_s18 = scalar_lea.vmem %s48_s16, 1024  ;;  %p1448_p11 = scmp.lt.s32.totalorder %s48_s16, %s48_s16 }
  0x1e   :  { %p1444_p10 = scmp.ne.s32.totalorder %s48_s16, %s1443_s18  ;;  %p1449_p12 = scmp.lt.s32.totalorder %s1443_s18, %s1443_s18 }
  0x20   :  { %p1450_p13 = por %p1449_p12, %p1448_p11 }
  0x22   :  { %p1451_p0 = pnand %p1450_p13, %p1444_p10 }
  0x24   :  { %1454 = shalt.err (!%p1451_p0)
}
  0x25   :  { %53 = dma.hbm_to_vmem [thread:$0]  %s1610_s3, 1024, %s48_s16, [#allocation6], %s1504_s27, %s1504_s27, %s1505_s28  }
  0x26   :  { %s1463_s0 = scalar_lea.vmem %s62_s1, 1024  ;;  %p1468_p2 = scmp.lt.s32.totalorder %s62_s1, %s62_s1 }
  0x27   :  { %p1464_p1 = scmp.ne.s32.totalorder %s62_s1, %s1463_s0  ;;  %p1469_p3 = scmp.lt.s32.totalorder %s1463_s0, %s1463_s0 }
  0x29   :  { %p1470_p4 = por %p1469_p3, %p1468_p2 }
  0x2b   :  { %p1471_p5 = pnand %p1470_p4, %p1464_p1 }
  0x2d   :  { %1474 = shalt.err (!%p1471_p5)
}
  0x2e   :  { %67 = dma.hbm_to_vmem [thread:$0]  %s1612_s5, 1024, %s62_s1, [#allocation9], %s1504_s27, %s1504_s27, %s1505_s28  }
  0x2f   :  { %1495 = dma.done.wait [#allocation3], 1024  }
  0x30   :  { %1496 = vsyncadd [#allocation3], 4294966272 }
  0x31   :  { %1497 = dma.done.wait [#allocation6], 9216  }
  0x32   :  { %1498 = vsyncadd [#allocation6], 4294958080 }
  0x33   :  { %1499 = dma.done.wait [#allocation9], 1024  }
  0x34   :  { %1500 = vsyncadd [#allocation9], 4294966272  ;;  %v1315_v0 = vld [vmem:[#allocation5 + $0x78] sm:$0xff]   ;;  %v1319_v4 = vld [vmem:[#allocation5 + $0x70] sm:$0xff]   ;;  %vm1512_vm0 = vmmov 0   ;;  %s1513_s26 = smov [#allocation10]  }
  0x35   :  { %v1316_v1 = vld [vmem:[#allocation5 + $0xf8] sm:$0xff]   ;;  %1156 = vmatprep.subr.bf16.mxu0 %v1315_v0  ;;  %v1320_v5 = vld [vmem:[#allocation5 + $0xf0] sm:$0xff]   ;;  %v1323_v8 = vld [vmem:[#allocation5 + $0x68] sm:$0xff]   ;;  %s1051_s27 = sshll.u32 %s1513_s26, 4  ;;  %s1052_s27 = int_to_ptr.vmem [resolvable:$true] %s1051_s27 }
  0x36   :  { %v1317_v2 = vld [vmem:[#allocation5 + $0x38] sm:$0xff]   ;;  %1178 = vmatprep.subr.bf16.mxu1 %v1316_v1  ;;  %v1321_v6 = vld [vmem:[#allocation5 + $0x30] sm:$0xff]   ;;  %v1324_v9 = vld [vmem:[#allocation5 + $0xe8] sm:$0xff]   ;;  %p1480_p7 = scmp.lt.s32.totalorder %s1052_s27, %s1052_s27 }
  0x37   :  { %v1318_v3 = vld [vmem:[#allocation5 + $0xb8] sm:$0xff]   ;;  %1157 = vmatpush3.bf16.msra.mxu0 %v1317_v2  ;;  %v1322_v7 = vld [vmem:[#allocation5 + $0xb0] sm:$0xff]   ;;  %v1325_v10 = vld [vmem:[#allocation5 + $0x28] sm:$0xff]  }
  0x38   :  { %1179 = vmatpush3.bf16.msra.mxu1 %v1318_v3  ;;  %1158 = vmatprep.subr.bf16.mxu0 %v1319_v4  ;;  %v1326_v11 = vld [vmem:[#allocation5 + $0xa8] sm:$0xff]   ;;  %v1327_v12 = vld [vmem:[#allocation5 + $0x60] sm:$0xff]   ;;  %v1331_v16 = vld [vmem:[#allocation5 + $0x58] sm:$0xff]  }
  0x39   :  { %1180 = vmatprep.subr.bf16.mxu1 %v1320_v5  ;;  %v1328_v13 = vld [vmem:[#allocation5 + $0xe0] sm:$0xff]   ;;  %v1332_v17 = vld [vmem:[#allocation5 + $0xd8] sm:$0xff]   ;;  %v1335_v20 = vld [vmem:[#allocation5 + $0x50] sm:$0xff]  }
  0x3a   :  { %v1329_v14 = vld [vmem:[#allocation5 + $0x20] sm:$0xff]   ;;  %v1333_v18 = vld [vmem:[#allocation5 + $0x18] sm:$0xff]   ;;  %v1336_v21 = vld [vmem:[#allocation5 + $0xd0] sm:$0xff]  }
  0x3b   :  { %1159 = vmatpush3.bf16.msra.mxu0 %v1321_v6  ;;  %v1330_v15 = vld [vmem:[#allocation5 + $0xa0] sm:$0xff]   ;;  %v1334_v19 = vld [vmem:[#allocation5 + $0x98] sm:$0xff]   ;;  %v1337_v22 = vld [vmem:[#allocation5 + $0x10] sm:$0xff]  }
  0x3c   :  { %1181 = vmatpush3.bf16.msra.mxu1 %v1322_v7  ;;  %1160 = vmatprep.subr.bf16.mxu0 %v1323_v8  ;;  %v1338_v23 = vld [vmem:[#allocation5 + $0x90] sm:$0xff]   ;;  %v1339_v24 = vld [vmem:[#allocation5 + $0x48] sm:$0xff]   ;;  %v1343_v28 = vld [vmem:[#allocation5 + $0x40] sm:$0xff]  }
  0x3d   :  { %1182 = vmatprep.subr.bf16.mxu1 %v1324_v9  ;;  %v1340_v25 = vld [vmem:[#allocation5 + $0xc8] sm:$0xff]   ;;  %v1344_v29 = vld [vmem:[#allocation5 + $0xc0] sm:$0xff]   ;;  %v1347_v40 = vld [vmem:[#allocation5 + $0x178] sm:$0xff]  }
  0x3e   :  { %v1341_v26 = vld [vmem:[#allocation5 + $0x8] sm:$0xff]   ;;  %v1345_v30 = vld [vmem:[#allocation5] sm:$0xff]   ;;  %v1348_v41 = vld [vmem:[#allocation5 + $0x1f8] sm:$0xff]  }
  0x3f   :  { %1161 = vmatpush3.bf16.msra.mxu0 %v1325_v10  ;;  %v1342_v27 = vld [vmem:[#allocation5 + $0x88] sm:$0xff]   ;;  %v1346_v31 = vld [vmem:[#allocation5 + $0x80] sm:$0xff]   ;;  %v1349_v42 = vld [vmem:[#allocation5 + $0x138] sm:$0xff]  }
  0x40   :  { %1183 = vmatpush3.bf16.msra.mxu1 %v1326_v11  ;;  %1162 = vmatprep.subr.bf16.mxu0 %v1327_v12  ;;  %v83_v32 = vld [vmem:[#allocation2] sm:$0xff]  ;;  %v84_v34 = vld [vmem:[#allocation2 + $0x8] sm:$0xff]  ;;  %v1350_v43 = vld [vmem:[#allocation5 + $0x1b8] sm:$0xff]  }
  0x41   :  { %1184 = vmatprep.subr.bf16.mxu1 %v1328_v13  ;;  %v87_v33 = vld [vmem:[#allocation2 + $0x20] sm:$0xff]  ;;  %v88_v37 = vld [vmem:[#allocation2 + $0x28] sm:$0xff]  ;;  %v1351_v44 = vld [vmem:[#allocation5 + $0x170] sm:$0xff]  }
  0x42   :  { %v1066_v35 = vcombine.low %v83_v32, %v87_v33  ;;  %v1067_v36 = vcombine.high %v83_v32, %v87_v33  ;;  %v1068_v38 = vcombine.low %v84_v34, %v88_v37  ;;  %v1069_v39 = vcombine.high %v84_v34, %v88_v37  ;;  %v1352_v45 = vld [vmem:[#allocation5 + $0x1f0] sm:$0xff]   ;;  %v1355_v48 = vld [vmem:[#allocation5 + $0x168] sm:$0xff]   ;;  %v1359_v52 = vld [vmem:[#allocation5 + $0x160] sm:$0xff]  }
  0x43   :  { %1163 = vmatpush3.bf16.msra.mxu0 %v1329_v14  ;;  %v1353_v46 = vld [vmem:[#allocation5 + $0x130] sm:$0xff]   ;;  %v1356_v49 = vld [vmem:[#allocation5 + $0x1e8] sm:$0xff]   ;;  %v1360_v53 = vld [vmem:[#allocation5 + $0x1e0] sm:$0xff]  }
  0x44   :  { %1185 = vmatpush3.bf16.msra.mxu1 %v1330_v15  ;;  %1164 = vmatprep.subr.bf16.mxu0 %v1331_v16  ;;  %v1354_v47 = vld [vmem:[#allocation5 + $0x1b0] sm:$0xff]   ;;  %v1357_v50 = vld [vmem:[#allocation5 + $0x128] sm:$0xff]   ;;  %v1361_v54 = vld [vmem:[#allocation5 + $0x120] sm:$0xff]  }
  0x45   :  { %1186 = vmatprep.subr.bf16.mxu1 %v1332_v17  ;;  %682 = vmatprep.mubr.bf16.mxu0 %v1067_v36  ;;  %v1358_v51 = vld [vmem:[#allocation5 + $0x1a8] sm:$0xff]   ;;  %v1362_v55 = vld [vmem:[#allocation5 + $0x1a0] sm:$0xff]   ;;  %v1363_v56 = vld [vmem:[#allocation5 + $0x158] sm:$0xff]   ;;  %v1511_v17 = vmov 0.0  }
  0x46   :  { %723 = vmatprep.mubr.bf16.mxu1 %v1069_v39  ;;  %v1364_v57 = vld [vmem:[#allocation5 + $0x1d8] sm:$0xff]   ;;  %v1367_v60 = vld [vmem:[#allocation5 + $0x150] sm:$0xff]   ;;  %v1371_v0 = vld [vmem:[#allocation5 + $0x148] sm:$0xff]  }
  0x47   :  { %1165 = vmatpush3.bf16.msra.mxu0 %v1333_v18  ;;  %v1365_v58 = vld [vmem:[#allocation5 + $0x118] sm:$0xff]   ;;  %v1368_v61 = vld [vmem:[#allocation5 + $0x1d0] sm:$0xff]   ;;  %v1372_v1 = vld [vmem:[#allocation5 + $0x1c8] sm:$0xff]  }
  0x48   :  { %1187 = vmatpush3.bf16.msra.mxu1 %v1334_v19  ;;  %1166 = vmatprep.subr.bf16.mxu0 %v1335_v20  ;;  %v1366_v59 = vld [vmem:[#allocation5 + $0x198] sm:$0xff]   ;;  %v1369_v62 = vld [vmem:[#allocation5 + $0x110] sm:$0xff]   ;;  %v1373_v2 = vld [vmem:[#allocation5 + $0x108] sm:$0xff]  }
  0x49   :  { %1188 = vmatprep.subr.bf16.mxu1 %v1336_v21  ;;  %v1370_v63 = vld [vmem:[#allocation5 + $0x190] sm:$0xff]   ;;  %v1374_v3 = vld [vmem:[#allocation5 + $0x188] sm:$0xff]   ;;  %v1375_v4 = vld [vmem:[#allocation5 + $0x140] sm:$0xff]  }
  0x4a   :  { %v1376_v5 = vld [vmem:[#allocation5 + $0x1c0] sm:$0xff]   ;;  %v85_v8 = vld [vmem:[#allocation2 + $0x10] sm:$0xff]  ;;  %v86_v12 = vld [vmem:[#allocation2 + $0x18] sm:$0xff] }
  0x4b   :  { %1167 = vmatpush3.bf16.msra.mxu0 %v1337_v22  ;;  %v1377_v6 = vld [vmem:[#allocation5 + $0x100] sm:$0xff]   ;;  %v89_v9 = vld [vmem:[#allocation2 + $0x30] sm:$0xff]  ;;  %v90_v13 = vld [vmem:[#allocation2 + $0x38] sm:$0xff] }
  0x4c   :  { %1189 = vmatpush3.bf16.msra.mxu1 %v1338_v23  ;;  %1168 = vmatprep.subr.bf16.mxu0 %v1339_v24  ;;  %v1378_v7 = vld [vmem:[#allocation5 + $0x180] sm:$0xff]   ;;  %v1070_v10 = vcombine.low %v85_v8, %v89_v9  ;;  %v1071_v11 = vcombine.high %v85_v8, %v89_v9  ;;  %v1072_v14 = vcombine.low %v86_v12, %v90_v13  ;;  %v1379_v16 = vld [vmem:[#allocation7 + $0x38] sm:$0xff]   ;;  %v1380_v18 = vld [vmem:[#allocation7 + $0x30] sm:$0xff]  }
  0x4d   :  { %1190 = vmatprep.subr.bf16.mxu1 %v1340_v25  ;;  %v1073_v15 = vcombine.high %v86_v12, %v90_v13  ;;  %v1381_v19 = vld [vmem:[#allocation7 + $0x28] sm:$0xff]   ;;  %v1382_v20 = vld [vmem:[#allocation7 + $0x20] sm:$0xff]   ;;  %v1383_v21 = vld [vmem:[#allocation7 + $0x18] sm:$0xff]  }
  0x4e   :  { %v1384_v22 = vld [vmem:[#allocation7 + $0x10] sm:$0xff]   ;;  %v1385_v23 = vld [vmem:[#allocation7 + $0x8] sm:$0xff]   ;;  %v1386_v24 = vld [vmem:[#allocation7] sm:$0xff]  }
  0x4f   :  { %1169 = vmatpush3.bf16.msra.mxu0 %v1341_v26  ;;  %v1387_v25 = vld [vmem:[#allocation8 + $0x38] sm:$0xff]   ;;  %v1388_v26 = vld [vmem:[#allocation8 + $0x30] sm:$0xff]   ;;  %v1065_v37 = vld [vmem:[%s1609_s2] ss:$0 sm:$0xff] }
  0x50   :  { %1191 = vmatpush3.bf16.msra.mxu1 %v1342_v27  ;;  %1170 = vmatprep.subr.bf16.mxu0 %v1343_v28  ;;  %v1389_v27 = vld [vmem:[#allocation8 + $0x28] sm:$0xff]   ;;  %v1390_v28 = vld [vmem:[#allocation8 + $0x20] sm:$0xff]  }
  0x51   :  { %1192 = vmatprep.subr.bf16.mxu1 %v1344_v29  ;;  %v1391_v29 = vld [vmem:[#allocation8 + $0x18] sm:$0xff]  }
  0x53   :  { %1171 = vmatpush3.bf16.msra.mxu0 %v1345_v30 }
  0x54   :  { %1193 = vmatpush3.bf16.msra.mxu1 %v1346_v31  ;;  %1200 = vmatprep.subr.bf16.mxu0 %v1347_v40 }
  0x55   :  { %1222 = vmatprep.subr.bf16.mxu1 %v1348_v41 }
  0x56   :  { %683 = vmatmul.mubr.bf16.vlgmr.msra.gmra.mxu0 %v1066_v35 }
  0x57   :  { %724 = vmatmul.mubr.bf16.vlgmr.msra.gmra.mxu1 %v1068_v38  ;;  %1201 = vmatpush3.bf16.msra.mxu0 %v1349_v42 }
  0x58   :  { %1223 = vmatpush3.bf16.msra.mxu1 %v1350_v43  ;;  %1202 = vmatprep.subr.bf16.mxu0 %v1351_v44 }
  0x59   :  { %1224 = vmatprep.subr.bf16.mxu1 %v1352_v45  ;;  %764 = vmatprep.mubr.bf16.mxu0 %v1071_v11 }
  0x5a   :  { %805 = vmatprep.mubr.bf16.mxu1 %v1073_v15  ;;  %v1147_v15 = vld [vmem:[%s1613_s6] ss:$0 sm:$0xff] }
  0x5b   :  { %1203 = vmatpush3.bf16.msra.mxu0 %v1353_v46 }
  0x5c   :  { %1225 = vmatpush3.bf16.msra.mxu1 %v1354_v47  ;;  %1204 = vmatprep.subr.bf16.mxu0 %v1355_v48 }
  0x5d   :  { %1226 = vmatprep.subr.bf16.mxu1 %v1356_v49 }
  0x5f   :  { %1205 = vmatpush3.bf16.msra.mxu0 %v1357_v50 }
  0x60   :  { %1227 = vmatpush3.bf16.msra.mxu1 %v1358_v51  ;;  %1206 = vmatprep.subr.bf16.mxu0 %v1359_v52 }
  0x61   :  { %1228 = vmatprep.subr.bf16.mxu1 %v1360_v53 }
  0x63   :  { %1207 = vmatpush3.bf16.msra.mxu0 %v1361_v54 }
  0x64   :  { %1229 = vmatpush3.bf16.msra.mxu1 %v1362_v55  ;;  %1208 = vmatprep.subr.bf16.mxu0 %v1363_v56 }
  0x65   :  { %1230 = vmatprep.subr.bf16.mxu1 %v1364_v57 }
  0x67   :  { %1209 = vmatpush3.bf16.msra.mxu0 %v1365_v58 }
  0x68   :  { %1231 = vmatpush3.bf16.msra.mxu1 %v1366_v59  ;;  %1210 = vmatprep.subr.bf16.mxu0 %v1367_v60 }
  0x69   :  { %1232 = vmatprep.subr.bf16.mxu1 %v1368_v61 }
  0x6b   :  { %1211 = vmatpush3.bf16.msra.mxu0 %v1369_v62 }
  0x6c   :  { %1233 = vmatpush3.bf16.msra.mxu1 %v1370_v63  ;;  %1212 = vmatprep.subr.bf16.mxu0 %v1371_v0 }
  0x6d   :  { %1234 = vmatprep.subr.bf16.mxu1 %v1372_v1 }
  0x6f   :  { %1213 = vmatpush3.bf16.msra.mxu0 %v1373_v2  ;;  %v1392_v2 = vld [vmem:[#allocation8 + $0x10] sm:$0xff]  }
  0x70   :  { %1235 = vmatpush3.bf16.msra.mxu1 %v1374_v3  ;;  %1214 = vmatprep.subr.bf16.mxu0 %v1375_v4  ;;  %v1393_v3 = vld [vmem:[#allocation8 + $0x8] sm:$0xff]   ;;  %v1394_v4 = vld [vmem:[#allocation8] sm:$0xff]  }
  0x71   :  { %1236 = vmatprep.subr.bf16.mxu1 %v1376_v5  ;;  %v1138_v5 = vld [vmem:[%s1611_s4] ss:$0 sm:$0xff]  ;;  %s1475_s4 = scalar_lea.vmem %s1052_s27, 256 }
  0x72   :  { %p1476_p6 = scmp.ne.s32.totalorder %s1052_s27, %s1475_s4  ;;  %p1481_p8 = scmp.lt.s32.totalorder %s1475_s4, %s1475_s4 }
  0x73   :  { %1215 = vmatpush3.bf16.msra.mxu0 %v1377_v6 }
  0x74   :  { %1237 = vmatpush3.bf16.msra.mxu1 %v1378_v7  ;;  %1262 = vmatprep.subr.bf16.mxu0 %v1511_v17  ;;  %p1482_p9 = por %p1481_p8, %p1480_p7 }
  0x75   :  { %1282 = vmatprep.subr.bf16.mxu1 %v1511_v17 }
  0x76   :  { %765 = vmatmul.mubr.bf16.vlgmr.msra.gmra.mxu0 %v1070_v10  ;;  %p1483_p10 = pnand %p1482_p9, %p1476_p6 }
  0x77   :  { %806 = vmatmul.mubr.bf16.vlgmr.msra.gmra.mxu1 %v1072_v14  ;;  %1263 = vmatpush3.bf16.msra.mxu0 %v1379_v16 }
  0x78   :  { %1264 = vmatprep.subr.bf16.mxu0 %v1511_v17  ;;  %1278 = vmatprep.mubr.msk.bf16.mxu0 %vm1512_vm0, %v1511_v17 }
  0x79   :  { %1298 = vmatprep.mubr.msk.bf16.mxu1 %vm1512_vm0, %v1511_v17  ;;  %1283 = vmatpush3.bf16.msra.mxu1 %v1387_v25 }
  0x7a   :  { %1284 = vmatprep.subr.bf16.mxu1 %v1511_v17 }
  0x7b   :  { %1265 = vmatpush3.bf16.msra.mxu0 %v1380_v18 }
  0x7c   :  { %1266 = vmatprep.subr.bf16.mxu0 %v1511_v17 }
  0x7d   :  { %1285 = vmatpush3.bf16.msra.mxu1 %v1388_v26 }
  0x7e   :  { %1286 = vmatprep.subr.bf16.mxu1 %v1511_v17 }
  0x7f   :  { %1267 = vmatpush3.bf16.msra.mxu0 %v1381_v19 }
  0x80   :  { %1268 = vmatprep.subr.bf16.mxu0 %v1511_v17 }
  0x81   :  { %1287 = vmatpush3.bf16.msra.mxu1 %v1389_v27 }
  0x82   :  { %1288 = vmatprep.subr.bf16.mxu1 %v1511_v17 }
  0x83   :  { %1269 = vmatpush3.bf16.msra.mxu0 %v1382_v20 }
  0x84   :  { %1270 = vmatprep.subr.bf16.mxu0 %v1511_v17 }
  0x85   :  { %1289 = vmatpush3.bf16.msra.mxu1 %v1390_v28 }
  0x86   :  { %1290 = vmatprep.subr.bf16.mxu1 %v1511_v17 }
  0x87   :  { %1271 = vmatpush3.bf16.msra.mxu0 %v1383_v21 }
  0x88   :  { %1272 = vmatprep.subr.bf16.mxu0 %v1511_v17 }
  0x89   :  { %1291 = vmatpush3.bf16.msra.mxu1 %v1391_v29 }
  0x8a   :  { %1292 = vmatprep.subr.bf16.mxu1 %v1511_v17 }
  0x8b   :  { %1273 = vmatpush3.bf16.msra.mxu0 %v1384_v22 }
  0x8c   :  { %1274 = vmatprep.subr.bf16.mxu0 %v1511_v17 }
  0x8d   :  { %1293 = vmatpush3.bf16.msra.mxu1 %v1392_v2 }
  0x8e   :  { %1294 = vmatprep.subr.bf16.mxu1 %v1511_v17 }
  0x8f   :  { %1275 = vmatpush3.bf16.msra.mxu0 %v1385_v23 }
  0x90   :  { %1276 = vmatprep.subr.bf16.mxu0 %v1511_v17 }
  0x91   :  { %1295 = vmatpush3.bf16.msra.mxu1 %v1393_v3 }
  0x92   :  { %1296 = vmatprep.subr.bf16.mxu1 %v1511_v17 }
  0x93   :  { %1277 = vmatpush3.bf16.msra.mxu0 %v1386_v24 }
  0x95   :  { %1297 = vmatpush3.bf16.msra.mxu1 %v1394_v4 }
 0x116   :  { %v1172_v30 = vpop.f32.mrf.mxu0 }
 0x117   :  { %v1194_v31 = vpop.f32.mrf.mxu1 }
 0x118   :  { %v1173_v32 = vpop.f32.mrf.mxu0 }
 0x119   :  { %v1195_v33 = vpop.f32.mrf.mxu1  ;;  %v1174_v35 = vadd.f32 %v1173_v32, %v1172_v30 }
 0x11a   :  { %v1175_v34 = vpop.f32.mrf.mxu0  ;;  %v1196_v40 = vadd.f32 %v1195_v33, %v1194_v31 }
 0x11b   :  { %v1197_v36 = vpop.f32.mrf.mxu1  ;;  %v685_v39 = vadd.f32 %v1174_v35, %v1065_v37 }
 0x11c   :  { %v1176_v38 = vpop.f32.mrf.mxu0 }
 0x11d   :  { %v1177_v41 = vadd.f32 %v1176_v38, %v1175_v34  ;;  %v1198_v42 = vpop.f32.mrf.mxu1  ;;  %v726_v46 = vadd.f32 %v1196_v40, %v685_v39 }
 0x11e   :  { %v1199_v51 = vadd.f32 %v1198_v42, %v1197_v36 }
 0x11f   :  { %v688_v47 = vadd.f32 %v1177_v41, %v1065_v37 }
 0x121   :  { %v729_v55 = vadd.f32 %v1199_v51, %v688_v47 }
 0x136   :  { %v1216_v43 = vpop.f32.mrf.mxu0 }
 0x137   :  { %v1238_v44 = vpop.f32.mrf.mxu1 }
 0x138   :  { %v1217_v45 = vpop.f32.mrf.mxu0 }
 0x139   :  { %v1218_v48 = vadd.f32 %v1217_v45, %v1216_v43  ;;  %v1239_v49 = vpop.f32.mrf.mxu1 }
 0x13a   :  { %v1219_v50 = vpop.f32.mrf.mxu0  ;;  %v1240_v56 = vadd.f32 %v1239_v49, %v1238_v44 }
 0x13b   :  { %v767_v52 = vadd.f32 %v1218_v48, %v726_v46  ;;  %v1241_v53 = vpop.f32.mrf.mxu1 }
 0x13c   :  { %v1220_v54 = vpop.f32.mrf.mxu0 }
 0x13d   :  { %v1221_v57 = vadd.f32 %v1220_v54, %v1219_v50  ;;  %v1242_v58 = vpop.f32.mrf.mxu1  ;;  %v808_v59 = vadd.f32 %v1240_v56, %v767_v52 }
 0x13e   :  { %v1243_v61 = vadd.f32 %v1242_v58, %v1241_v53 }
 0x13f   :  { %v770_v60 = vadd.f32 %v1221_v57, %v729_v55  ;;  %v814_v63 = vmax.f32 %v808_v59, 0.0 }
 0x141   :  { %v811_v62 = vadd.f32 %v1243_v61, %v770_v60 }
 0x143   :  { %v815_v0 = vmax.f32 %v811_v62, 0.0 }
 0x145   :  { %v816_v1 = vpack.c.bf16 %v815_v0, %v814_v63 }
 0x147   :  { %1279 = vmatmul.mubr.bf16.vlgmr.msra.gmra.mxu0 %v816_v1 }
 0x207   :  { %v922_v6 = vpop.f32.mrf.mxu0 }
 0x208   :  { %v923_v8 = vadd.f32 %v1138_v5, %v922_v6 }
 0x209   :  { %v1280_v7 = vpop.f32.mrf.mxu0 }
 0x20a   :  { %v929_v12 = vmax.f32 %v923_v8, 0.0 }
 0x20b   :  { %v925_v9 = vpop.f32.mrf.mxu0 }
 0x20c   :  { %v926_v10 = vadd.f32 %v1138_v5, %v925_v9 }
 0x20d   :  { %v1281_v11 = vpop.f32.mrf.mxu0 }
 0x20e   :  { %v930_v13 = vmax.f32 %v926_v10, 0.0 }
 0x210   :  { %v931_v14 = vpack.c.bf16 %v930_v13, %v929_v12 }
 0x212   :  { %1299 = vmatmul.mubr.bf16.vlgmr.msra.gmra.mxu1 %v931_v14 }
 0x2d2   :  { %v1037_v16 = vpop.f32.mrf.mxu1 }
 0x2d3   :  { %v1038_v17 = vadd.f32 %v1147_v15, %v1037_v16 }
 0x2d4   :  { %v1300_v18 = vpop.f32.mrf.mxu1 }
 0x2d5   :  { %1044 = vst [vmem:[#allocation10] sm:$0xff] %v1038_v17 }
 0x2d6   :  { %v1040_v19 = vpop.f32.mrf.mxu1 }
 0x2d7   :  { %v1041_v20 = vadd.f32 %v1147_v15, %v1040_v19 }
 0x2d8   :  { %v1301_v21 = vpop.f32.mrf.mxu1 }
 0x2d9   :  { %1045 = vst [vmem:[#allocation10 + $0x8] sm:$0xff] %v1041_v20 }
 0x2da   :  { %1486 = shalt.err (!%p1483_p10)
}
 0x2db   :  { %s1514_s28 = smov 128   ;;  %s1515_s6 = smov 8  }
 0x2dc   :  { %1057 = dma.vmem_to_hbm [thread:$0]  %s1052_s27, 256, %s1614_s7, [#allocation4], %s1514_s28, %s1514_s28, %s1515_s6  }
 0x2dd   :  { %1501 = dma.done.wait [#allocation4], 256  }
 0x2de   :  { %1502 = vsyncadd [#allocation4], 4294967040 }
 0x2df   :  { %1061 = vsyncpa [#allocation3], 1 }
 0x2e0   :  { %1062 = vsyncpa [#allocation6], 1 }
 0x2e1   :  { %1063 = vsyncpa [#allocation9], 1 }
 0x2e2   :  { %1064 = vsyncpa [#allocation4], 1 }

// kernel: tpu_custom_call.1
= control target key start
LH: loop header
LB: loop body
LE: loop exit
PB: predicated region body
PF: predicated region fallthrough
CT: control target
= control target key end

     0   :  { %12 = vsyncpa [#allocation3], 0  ;;  %s1607_s0 = inlined_call_operand.hbm [shape: bf16[16,1024], index: 0, kind: input, shape index: {}]   ;;  %s1608_s1 = inlined_call_operand.hbm [shape: bf16[1024,128], index: 1, kind: input, shape index: {}]   ;;  %s1609_s2 = inlined_call_operand.vmem [shape: f32[1,128], index: 2, kind: input, shape index: {}]   ;;  %s1610_s3 = inlined_call_operand.hbm [shape: bf16[128,128], index: 3, kind: input, shape index: {}]   ;;  %s1611_s4 = inlined_call_operand.vmem [shape: f32[1,128], index: 4, kind: input, shape index: {}]   ;;  %s1612_s5 = inlined_call_operand.hbm [shape: bf16[128,128], index: 5, kind: input, shape index: {}]   ;;  %s1613_s6 = inlined_call_operand.vmem [shape: f32[1,128], index: 6, kind: input, shape index: {}]   ;;  %s1614_s7 = inlined_call_operand.hbm [shape: f32[16,128], index: 7, kind: output, shape index: {}]  }
   0x1   :  { %13 = vsyncpa [#allocation6], 0 }
   0x2   :  { %14 = vsyncpa [#allocation9], 0 }
   0x3   :  { %15 = vsyncpa [#allocation4], 0  ;;  %s1503_s24 = smov [#allocation5]  }
   0x4   :  { %s33_s25 = sshll.u32 %s1503_s24, 4  ;;  %s34_s25 = int_to_ptr.vmem [resolvable:$true] %s33_s25 }
   0x5   :  { %s1403_s26 = scalar_lea.vmem %s34_s25, 8192  ;;  %p1408_p1 = scmp.lt.s32.totalorder %s34_s25, %s34_s25 }
   0x6   :  { %p1404_p0 = scmp.ne.s32.totalorder %s34_s25, %s1403_s26  ;;  %p1409_p2 = scmp.lt.s32.totalorder %s1403_s26, %s1403_s26 }
   0x8   :  { %p1410_p3 = por %p1409_p2, %p1408_p1 }
   0xa   :  { %p1411_p4 = pnand %p1410_p3, %p1404_p0 }
   0xc   :  { %1414 = shalt.err (!%p1411_p4)
}
   0xd   :  { %s1504_s27 = smov 64   ;;  %s1505_s28 = smov 4  }
   0xe   :  { %39 = dma.hbm_to_vmem [thread:$0]  %s1608_s1, 8192, %s34_s25, [#allocation6], %s1504_s27, %s1504_s27, %s1505_s28  }
   0xf   :  { %s1506_s8 = smov [#allocation2]  }
  0x10   :  { %s21_s9 = sshll.u32 %s1506_s8, 4  ;;  %s22_s9 = int_to_ptr.vmem [resolvable:$true] %s21_s9 }
  0x11   :  { %s1423_s10 = scalar_lea.vmem %s22_s9, 1024  ;;  %p1428_p6 = scmp.lt.s32.totalorder %s22_s9, %s22_s9 }
  0x12   :  { %p1424_p5 = scmp.ne.s32.totalorder %s22_s9, %s1423_s10  ;;  %p1429_p7 = scmp.lt.s32.totalorder %s1423_s10, %s1423_s10 }
  0x14   :  { %p1430_p8 = por %p1429_p7, %p1428_p6 }
  0x16   :  { %p1431_p9 = pnand %p1430_p8, %p1424_p5 }
  0x18   :  { %1434 = shalt.err (!%p1431_p9)
}
  0x19   :  { %s1507_s11 = smov 512   ;;  %s1508_s12 = smov 32  }
  0x1a   :  { %27 = dma.hbm_to_vmem [thread:$0]  %s1607_s0, 1024, %s22_s9, [#allocation3], %s1507_s11, %s1507_s11, %s1508_s12  }
  0x1b   :  { %s1509_s15 = smov [#allocation7]   ;;  %s1510_s17 = smov [#allocation8]  }
  0x1c   :  { %s47_s16 = sshll.u32 %s1509_s15, 4  ;;  %s61_s1 = sshll.u32 %s1510_s17, 4  ;;  %s48_s16 = int_to_ptr.vmem [resolvable:$true] %s47_s16  ;;  %s62_s1 = int_to_ptr.vmem [resolvable:$true] %s61_s1 }
  0x1d   :  { %s1443_s18 = scalar_lea.vmem %s48_s16, 1024  ;;  %p1448_p11 = scmp.lt.s32.totalorder %s48_s16, %s48_s16 }
  0x1e   :  { %p1444_p10 = scmp.ne.s32.totalorder %s48_s16, %s1443_s18  ;;  %p1449_p12 = scmp.lt.s32.totalorder %s1443_s18, %s1443_s18 }
  0x20   :  { %p1450_p13 = por %p1449_p12, %p1448_p11 }
  0x22   :  { %p1451_p0 = pnand %p1450_p13, %p1444_p10 }
  0x24   :  { %1454 = shalt.err (!%p1451_p0)
}
  0x25   :  { %53 = dma.hbm_to_vmem [thread:$0]  %s1610_s3, 1024, %s48_s16, [#allocation6], %s1504_s27, %s1504_s27, %s1505_s28  }
  0x26   :  { %s1463_s0 = scalar_lea.vmem %s62_s1, 1024  ;;  %p1468_p2 = scmp.lt.s32.totalorder %s62_s1, %s62_s1 }
  0x27   :  { %p1464_p1 = scmp.ne.s32.totalorder %s62_s1, %s1463_s0  ;;  %p1469_p3 = scmp.lt.s32.totalorder %s1463_s0, %s1463_s0 }
  0x29   :  { %p1470_p4 = por %p1469_p3, %p1468_p2 }
  0x2b   :  { %p1471_p5 = pnand %p1470_p4, %p1464_p1 }
  0x2d   :  { %1474 = shalt.err (!%p1471_p5)
}
  0x2e   :  { %67 = dma.hbm_to_vmem [thread:$0]  %s1612_s5, 1024, %s62_s1, [#allocation9], %s1504_s27, %s1504_s27, %s1505_s28  }
  0x2f   :  { %1495 = dma.done.wait [#allocation3], 1024  }
  0x30   :  { %1496 = vsyncadd [#allocation3], 4294966272 }
  0x31   :  { %1497 = dma.done.wait [#allocation6], 9216  }
  0x32   :  { %1498 = vsyncadd [#allocation6], 4294958080 }
  0x33   :  { %1499 = dma.done.wait [#allocation9], 1024  }
  0x34   :  { %1500 = vsyncadd [#allocation9], 4294966272  ;;  %v1315_v0 = vld [vmem:[#allocation5 + $0x78] sm:$0xff]   ;;  %v1319_v4 = vld [vmem:[#allocation5 + $0x70] sm:$0xff]   ;;  %vm1512_vm0 = vmmov 0   ;;  %s1513_s26 = smov [#allocation10]  }
  0x35   :  { %v1316_v1 = vld [vmem:[#allocation5 + $0xf8] sm:$0xff]   ;;  %1156 = vmatprep.subr.bf16.mxu0 %v1315_v0  ;;  %v1320_v5 = vld [vmem:[#allocation5 + $0xf0] sm:$0xff]   ;;  %v1323_v8 = vld [vmem:[#allocation5 + $0x68] sm:$0xff]   ;;  %s1051_s27 = sshll.u32 %s1513_s26, 4  ;;  %s1052_s27 = int_to_ptr.vmem [resolvable:$true] %s1051_s27 }
  0x36   :  { %v1317_v2 = vld [vmem:[#allocation5 + $0x38] sm:$0xff]   ;;  %1178 = vmatprep.subr.bf16.mxu1 %v1316_v1  ;;  %v1321_v6 = vld [vmem:[#allocation5 + $0x30] sm:$0xff]   ;;  %v1324_v9 = vld [vmem:[#allocation5 + $0xe8] sm:$0xff]   ;;  %p1480_p7 = scmp.lt.s32.totalorder %s1052_s27, %s1052_s27 }
  0x37   :  { %v1318_v3 = vld [vmem:[#allocation5 + $0xb8] sm:$0xff]   ;;  %1157 = vmatpush3.bf16.msra.mxu0 %v1317_v2  ;;  %v1322_v7 = vld [vmem:[#allocation5 + $0xb0] sm:$0xff]   ;;  %v1325_v10 = vld [vmem:[#allocation5 + $0x28] sm:$0xff]  }
  0x38   :  { %1179 = vmatpush3.bf16.msra.mxu1 %v1318_v3  ;;  %1158 = vmatprep.subr.bf16.mxu0 %v1319_v4  ;;  %v1326_v11 = vld [vmem:[#allocation5 + $0xa8] sm:$0xff]   ;;  %v1327_v12 = vld [vmem:[#allocation5 + $0x60] sm:$0xff]   ;;  %v1331_v16 = vld [vmem:[#allocation5 + $0x58] sm:$0xff]  }
  0x39   :  { %1180 = vmatprep.subr.bf16.mxu1 %v1320_v5  ;;  %v1328_v13 = vld [vmem:[#allocation5 + $0xe0] sm:$0xff]   ;;  %v1332_v17 = vld [vmem:[#allocation5 + $0xd8] sm:$0xff]   ;;  %v1335_v20 = vld [vmem:[#allocation5 + $0x50] sm:$0xff]  }
  0x3a   :  { %v1329_v14 = vld [vmem:[#allocation5 + $0x20] sm:$0xff]   ;;  %v1333_v18 = vld [vmem:[#allocation5 + $0x18] sm:$0xff]   ;;  %v1336_v21 = vld [vmem:[#allocation5 + $0xd0] sm:$0xff]  }
  0x3b   :  { %1159 = vmatpush3.bf16.msra.mxu0 %v1321_v6  ;;  %v1330_v15 = vld [vmem:[#allocation5 + $0xa0] sm:$0xff]   ;;  %v1334_v19 = vld [vmem:[#allocation5 + $0x98] sm:$0xff]   ;;  %v1337_v22 = vld [vmem:[#allocation5 + $0x10] sm:$0xff]  }
  0x3c   :  { %1181 = vmatpush3.bf16.msra.mxu1 %v1322_v7  ;;  %1160 = vmatprep.subr.bf16.mxu0 %v1323_v8  ;;  %v1338_v23 = vld [vmem:[#allocation5 + $0x90] sm:$0xff]   ;;  %v1339_v24 = vld [vmem:[#allocation5 + $0x48] sm:$0xff]   ;;  %v1343_v28 = vld [vmem:[#allocation5 + $0x40] sm:$0xff]  }
  0x3d   :  { %1182 = vmatprep.subr.bf16.mxu1 %v1324_v9  ;;  %v1340_v25 = vld [vmem:[#allocation5 + $0xc8] sm:$0xff]   ;;  %v1344_v29 = vld [vmem:[#allocation5 + $0xc0] sm:$0xff]   ;;  %v1347_v40 = vld [vmem:[#allocation5 + $0x178] sm:$0xff]  }
  0x3e   :  { %v1341_v26 = vld [vmem:[#allocation5 + $0x8] sm:$0xff]   ;;  %v1345_v30 = vld [vmem:[#allocation5] sm:$0xff]   ;;  %v1348_v41 = vld [vmem:[#allocation5 + $0x1f8] sm:$0xff]  }
  0x3f   :  { %1161 = vmatpush3.bf16.msra.mxu0 %v1325_v10  ;;  %v1342_v27 = vld [vmem:[#allocation5 + $0x88] sm:$0xff]   ;;  %v1346_v31 = vld [vmem:[#allocation5 + $0x80] sm:$0xff]   ;;  %v1349_v42 = vld [vmem:[#allocation5 + $0x138] sm:$0xff]  }
  0x40   :  { %1183 = vmatpush3.bf16.msra.mxu1 %v1326_v11  ;;  %1162 = vmatprep.subr.bf16.mxu0 %v1327_v12  ;;  %v83_v32 = vld [vmem:[#allocation2] sm:$0xff]  ;;  %v84_v34 = vld [vmem:[#allocation2 + $0x8] sm:$0xff]  ;;  %v1350_v43 = vld [vmem:[#allocation5 + $0x1b8] sm:$0xff]  }
  0x41   :  { %1184 = vmatprep.subr.bf16.mxu1 %v1328_v13  ;;  %v87_v33 = vld [vmem:[#allocation2 + $0x20] sm:$0xff]  ;;  %v88_v37 = vld [vmem:[#allocation2 + $0x28] sm:$0xff]  ;;  %v1351_v44 = vld [vmem:[#allocation5 + $0x170] sm:$0xff]  }
  0x42   :  { %v1066_v35 = vcombine.low %v83_v32, %v87_v33  ;;  %v1067_v36 = vcombine.high %v83_v32, %v87_v33  ;;  %v1068_v38 = vcombine.low %v84_v34, %v88_v37  ;;  %v1069_v39 = vcombine.high %v84_v34, %v88_v37  ;;  %v1352_v45 = vld [vmem:[#allocation5 + $0x1f0] sm:$0xff]   ;;  %v1355_v48 = vld [vmem:[#allocation5 + $0x168] sm:$0xff]   ;;  %v1359_v52 = vld [vmem:[#allocation5 + $0x160] sm:$0xff]  }
  0x43   :  { %1163 = vmatpush3.bf16.msra.mxu0 %v1329_v14  ;;  %v1353_v46 = vld [vmem:[#allocation5 + $0x130] sm:$0xff]   ;;  %v1356_v49 = vld [vmem:[#allocation5 + $0x1e8] sm:$0xff]   ;;  %v1360_v53 = vld [vmem:[#allocation5 + $0x1e0] sm:$0xff]  }
  0x44   :  { %1185 = vmatpush3.bf16.msra.mxu1 %v1330_v15  ;;  %1164 = vmatprep.subr.bf16.mxu0 %v1331_v16  ;;  %v1354_v47 = vld [vmem:[#allocation5 + $0x1b0] sm:$0xff]   ;;  %v1357_v50 = vld [vmem:[#allocation5 + $0x128] sm:$0xff]   ;;  %v1361_v54 = vld [vmem:[#allocation5 + $0x120] sm:$0xff]  }
  0x45   :  { %1186 = vmatprep.subr.bf16.mxu1 %v1332_v17  ;;  %682 = vmatprep.mubr.bf16.mxu0 %v1067_v36  ;;  %v1358_v51 = vld [vmem:[#allocation5 + $0x1a8] sm:$0xff]   ;;  %v1362_v55 = vld [vmem:[#allocation5 + $0x1a0] sm:$0xff]   ;;  %v1363_v56 = vld [vmem:[#allocation5 + $0x158] sm:$0xff]   ;;  %v1511_v17 = vmov 0.0  }
  0x46   :  { %723 = vmatprep.mubr.bf16.mxu1 %v1069_v39  ;;  %v1364_v57 = vld [vmem:[#allocation5 + $0x1d8] sm:$0xff]   ;;  %v1367_v60 = vld [vmem:[#allocation5 + $0x150] sm:$0xff]   ;;  %v1371_v0 = vld [vmem:[#allocation5 + $0x148] sm:$0xff]  }
  0x47   :  { %1165 = vmatpush3.bf16.msra.mxu0 %v1333_v18  ;;  %v1365_v58 = vld [vmem:[#allocation5 + $0x118] sm:$0xff]   ;;  %v1368_v61 = vld [vmem:[#allocation5 + $0x1d0] sm:$0xff]   ;;  %v1372_v1 = vld [vmem:[#allocation5 + $0x1c8] sm:$0xff]  }
  0x48   :  { %1187 = vmatpush3.bf16.msra.mxu1 %v1334_v19  ;;  %1166 = vmatprep.subr.bf16.mxu0 %v1335_v20  ;;  %v1366_v59 = vld [vmem:[#allocation5 + $0x198] sm:$0xff]   ;;  %v1369_v62 = vld [vmem:[#allocation5 + $0x110] sm:$0xff]   ;;  %v1373_v2 = vld [vmem:[#allocation5 + $0x108] sm:$0xff]  }
  0x49   :  { %1188 = vmatprep.subr.bf16.mxu1 %v1336_v21  ;;  %v1370_v63 = vld [vmem:[#allocation5 + $0x190] sm:$0xff]   ;;  %v1374_v3 = vld [vmem:[#allocation5 + $0x188] sm:$0xff]   ;;  %v1375_v4 = vld [vmem:[#allocation5 + $0x140] sm:$0xff]  }
  0x4a   :  { %v1376_v5 = vld [vmem:[#allocation5 + $0x1c0] sm:$0xff]   ;;  %v85_v8 = vld [vmem:[#allocation2 + $0x10] sm:$0xff]  ;;  %v86_v12 = vld [vmem:[#allocation2 + $0x18] sm:$0xff] }
  0x4b   :  { %1167 = vmatpush3.bf16.msra.mxu0 %v1337_v22  ;;  %v1377_v6 = vld [vmem:[#allocation5 + $0x100] sm:$0xff]   ;;  %v89_v9 = vld [vmem:[#allocation2 + $0x30] sm:$0xff]  ;;  %v90_v13 = vld [vmem:[#allocation2 + $0x38] sm:$0xff] }
  0x4c   :  { %1189 = vmatpush3.bf16.msra.mxu1 %v1338_v23  ;;  %1168 = vmatprep.subr.bf16.mxu0 %v1339_v24  ;;  %v1378_v7 = vld [vmem:[#allocation5 + $0x180] sm:$0xff]   ;;  %v1070_v10 = vcombine.low %v85_v8, %v89_v9  ;;  %v1071_v11 = vcombine.high %v85_v8, %v89_v9  ;;  %v1072_v14 = vcombine.low %v86_v12, %v90_v13  ;;  %v1379_v16 = vld [vmem:[#allocation7 + $0x38] sm:$0xff]   ;;  %v1380_v18 = vld [vmem:[#allocation7 + $0x30] sm:$0xff]  }
  0x4d   :  { %1190 = vmatprep.subr.bf16.mxu1 %v1340_v25  ;;  %v1073_v15 = vcombine.high %v86_v12, %v90_v13  ;;  %v1381_v19 = vld [vmem:[#allocation7 + $0x28] sm:$0xff]   ;;  %v1382_v20 = vld [vmem:[#allocation7 + $0x20] sm:$0xff]   ;;  %v1383_v21 = vld [vmem:[#allocation7 + $0x18] sm:$0xff]  }
  0x4e   :  { %v1384_v22 = vld [vmem:[#allocation7 + $0x10] sm:$0xff]   ;;  %v1385_v23 = vld [vmem:[#allocation7 + $0x8] sm:$0xff]   ;;  %v1386_v24 = vld [vmem:[#allocation7] sm:$0xff]  }
  0x4f   :  { %1169 = vmatpush3.bf16.msra.mxu0 %v1341_v26  ;;  %v1387_v25 = vld [vmem:[#allocation8 + $0x38] sm:$0xff]   ;;  %v1388_v26 = vld [vmem:[#allocation8 + $0x30] sm:$0xff]   ;;  %v1065_v37 = vld [vmem:[%s1609_s2] ss:$0 sm:$0xff] }
  0x50   :  { %1191 = vmatpush3.bf16.msra.mxu1 %v1342_v27  ;;  %1170 = vmatprep.subr.bf16.mxu0 %v1343_v28  ;;  %v1389_v27 = vld [vmem:[#allocation8 + $0x28] sm:$0xff]   ;;  %v1390_v28 = vld [vmem:[#allocation8 + $0x20] sm:$0xff]  }
  0x51   :  { %1192 = vmatprep.subr.bf16.mxu1 %v1344_v29  ;;  %v1391_v29 = vld [vmem:[#allocation8 + $0x18] sm:$0xff]  }
  0x53   :  { %1171 = vmatpush3.bf16.msra.mxu0 %v1345_v30 }
  0x54   :  { %1193 = vmatpush3.bf16.msra.mxu1 %v1346_v31  ;;  %1200 = vmatprep.subr.bf16.mxu0 %v1347_v40 }
  0x55   :  { %1222 = vmatprep.subr.bf16.mxu1 %v1348_v41 }
  0x56   :  { %683 = vmatmul.mubr.bf16.vlgmr.msra.gmra.mxu0 %v1066_v35 }
  0x57   :  { %724 = vmatmul.mubr.bf16.vlgmr.msra.gmra.mxu1 %v1068_v38  ;;  %1201 = vmatpush3.bf16.msra.mxu0 %v1349_v42 }
  0x58   :  { %1223 = vmatpush3.bf16.msra.mxu1 %v1350_v43  ;;  %1202 = vmatprep.subr.bf16.mxu0 %v1351_v44 }
  0x59   :  { %1224 = vmatprep.subr.bf16.mxu1 %v1352_v45  ;;  %764 = vmatprep.mubr.bf16.mxu0 %v1071_v11 }
  0x5a   :  { %805 = vmatprep.mubr.bf16.mxu1 %v1073_v15  ;;  %v1147_v15 = vld [vmem:[%s1613_s6] ss:$0 sm:$0xff] }
  0x5b   :  { %1203 = vmatpush3.bf16.msra.mxu0 %v1353_v46 }
  0x5c   :  { %1225 = vmatpush3.bf16.msra.mxu1 %v1354_v47  ;;  %1204 = vmatprep.subr.bf16.mxu0 %v1355_v48 }
  0x5d   :  { %1226 = vmatprep.subr.bf16.mxu1 %v1356_v49 }
  0x5f   :  { %1205 = vmatpush3.bf16.msra.mxu0 %v1357_v50 }
  0x60   :  { %1227 = vmatpush3.bf16.msra.mxu1 %v1358_v51  ;;  %1206 = vmatprep.subr.bf16.mxu0 %v1359_v52 }
  0x61   :  { %1228 = vmatprep.subr.bf16.mxu1 %v1360_v53 }
  0x63   :  { %1207 = vmatpush3.bf16.msra.mxu0 %v1361_v54 }
  0x64   :  { %1229 = vmatpush3.bf16.msra.mxu1 %v1362_v55  ;;  %1208 = vmatprep.subr.bf16.mxu0 %v1363_v56 }
  0x65   :  { %1230 = vmatprep.subr.bf16.mxu1 %v1364_v57 }
  0x67   :  { %1209 = vmatpush3.bf16.msra.mxu0 %v1365_v58 }
  0x68   :  { %1231 = vmatpush3.bf16.msra.mxu1 %v1366_v59  ;;  %1210 = vmatprep.subr.bf16.mxu0 %v1367_v60 }
  0x69   :  { %1232 = vmatprep.subr.bf16.mxu1 %v1368_v61 }
  0x6b   :  { %1211 = vmatpush3.bf16.msra.mxu0 %v1369_v62 }
  0x6c   :  { %1233 = vmatpush3.bf16.msra.mxu1 %v1370_v63  ;;  %1212 = vmatprep.subr.bf16.mxu0 %v1371_v0 }
  0x6d   :  { %1234 = vmatprep.subr.bf16.mxu1 %v1372_v1 }
  0x6f   :  { %1213 = vmatpush3.bf16.msra.mxu0 %v1373_v2  ;;  %v1392_v2 = vld [vmem:[#allocation8 + $0x10] sm:$0xff]  }
  0x70   :  { %1235 = vmatpush3.bf16.msra.mxu1 %v1374_v3  ;;  %1214 = vmatprep.subr.bf16.mxu0 %v1375_v4  ;;  %v1393_v3 = vld [vmem:[#allocation8 + $0x8] sm:$0xff]   ;;  %v1394_v4 = vld [vmem:[#allocation8] sm:$0xff]  }
  0x71   :  { %1236 = vmatprep.subr.bf16.mxu1 %v1376_v5  ;;  %v1138_v5 = vld [vmem:[%s1611_s4] ss:$0 sm:$0xff]  ;;  %s1475_s4 = scalar_lea.vmem %s1052_s27, 256 }
  0x72   :  { %p1476_p6 = scmp.ne.s32.totalorder %s1052_s27, %s1475_s4  ;;  %p1481_p8 = scmp.lt.s32.totalorder %s1475_s4, %s1475_s4 }
  0x73   :  { %1215 = vmatpush3.bf16.msra.mxu0 %v1377_v6 }
  0x74   :  { %1237 = vmatpush3.bf16.msra.mxu1 %v1378_v7  ;;  %1262 = vmatprep.subr.bf16.mxu0 %v1511_v17  ;;  %p1482_p9 = por %p1481_p8, %p1480_p7 }
  0x75   :  { %1282 = vmatprep.subr.bf16.mxu1 %v1511_v17 }
  0x76   :  { %765 = vmatmul.mubr.bf16.vlgmr.msra.gmra.mxu0 %v1070_v10  ;;  %p1483_p10 = pnand %p1482_p9, %p1476_p6 }
  0x77   :  { %806 = vmatmul.mubr.bf16.vlgmr.msra.gmra.mxu1 %v1072_v14  ;;  %1263 = vmatpush3.bf16.msra.mxu0 %v1379_v16 }
  0x78   :  { %1264 = vmatprep.subr.bf16.mxu0 %v1511_v17  ;;  %1278 = vmatprep.mubr.msk.bf16.mxu0 %vm1512_vm0, %v1511_v17 }
  0x79   :  { %1298 = vmatprep.mubr.msk.bf16.mxu1 %vm1512_vm0, %v1511_v17  ;;  %1283 = vmatpush3.bf16.msra.mxu1 %v1387_v25 }
  0x7a   :  { %1284 = vmatprep.subr.bf16.mxu1 %v1511_v17 }
  0x7b   :  { %1265 = vmatpush3.bf16.msra.mxu0 %v1380_v18 }
  0x7c   :  { %1266 = vmatprep.subr.bf16.mxu0 %v1511_v17 }
  0x7d   :  { %1285 = vmatpush3.bf16.msra.mxu1 %v1388_v26 }
  0x7e   :  { %1286 = vmatprep.subr.bf16.mxu1 %v1511_v17 }
  0x7f   :  { %1267 = vmatpush3.bf16.msra.mxu0 %v1381_v19 }
  0x80   :  { %1268 = vmatprep.subr.bf16.mxu0 %v1511_v17 }
  0x81   :  { %1287 = vmatpush3.bf16.msra.mxu1 %v1389_v27 }
  0x82   :  { %1288 = vmatprep.subr.bf16.mxu1 %v1511_v17 }
  0x83   :  { %1269 = vmatpush3.bf16.msra.mxu0 %v1382_v20 }
  0x84   :  { %1270 = vmatprep.subr.bf16.mxu0 %v1511_v17 }
  0x85   :  { %1289 = vmatpush3.bf16.msra.mxu1 %v1390_v28 }
  0x86   :  { %1290 = vmatprep.subr.bf16.mxu1 %v1511_v17 }
  0x87   :  { %1271 = vmatpush3.bf16.msra.mxu0 %v1383_v21 }
  0x88   :  { %1272 = vmatprep.subr.bf16.mxu0 %v1511_v17 }
  0x89   :  { %1291 = vmatpush3.bf16.msra.mxu1 %v1391_v29 }
  0x8a   :  { %1292 = vmatprep.subr.bf16.mxu1 %v1511_v17 }
  0x8b   :  { %1273 = vmatpush3.bf16.msra.mxu0 %v1384_v22 }
  0x8c   :  { %1274 = vmatprep.subr.bf16.mxu0 %v1511_v17 }
  0x8d   :  { %1293 = vmatpush3.bf16.msra.mxu1 %v1392_v2 }
  0x8e   :  { %1294 = vmatprep.subr.bf16.mxu1 %v1511_v17 }
  0x8f   :  { %1275 = vmatpush3.bf16.msra.mxu0 %v1385_v23 }
  0x90   :  { %1276 = vmatprep.subr.bf16.mxu0 %v1511_v17 }
  0x91   :  { %1295 = vmatpush3.bf16.msra.mxu1 %v1393_v3 }
  0x92   :  { %1296 = vmatprep.subr.bf16.mxu1 %v1511_v17 }
  0x93   :  { %1277 = vmatpush3.bf16.msra.mxu0 %v1386_v24 }
  0x95   :  { %1297 = vmatpush3.bf16.msra.mxu1 %v1394_v4 }
 0x116   :  { %v1172_v30 = vpop.f32.mrf.mxu0 }
 0x117   :  { %v1194_v31 = vpop.f32.mrf.mxu1 }
 0x118   :  { %v1173_v32 = vpop.f32.mrf.mxu0 }
 0x119   :  { %v1195_v33 = vpop.f32.mrf.mxu1  ;;  %v1174_v35 = vadd.f32 %v1173_v32, %v1172_v30 }
 0x11a   :  { %v1175_v34 = vpop.f32.mrf.mxu0  ;;  %v1196_v40 = vadd.f32 %v1195_v33, %v1194_v31 }
 0x11b   :  { %v1197_v36 = vpop.f32.mrf.mxu1  ;;  %v685_v39 = vadd.f32 %v1174_v35, %v1065_v37 }
 0x11c   :  { %v1176_v38 = vpop.f32.mrf.mxu0 }
 0x11d   :  { %v1177_v41 = vadd.f32 %v1176_v38, %v1175_v34  ;;  %v1198_v42 = vpop.f32.mrf.mxu1  ;;  %v726_v46 = vadd.f32 %v1196_v40, %v685_v39 }
 0x11e   :  { %v1199_v51 = vadd.f32 %v1198_v42, %v1197_v36 }
 0x11f   :  { %v688_v47 = vadd.f32 %v1177_v41, %v1065_v37 }
 0x121   :  { %v729_v55 = vadd.f32 %v1199_v51, %v688_v47 }
 0x136   :  { %v1216_v43 = vpop.f32.mrf.mxu0 }
 0x137   :  { %v1238_v44 = vpop.f32.mrf.mxu1 }
 0x138   :  { %v1217_v45 = vpop.f32.mrf.mxu0 }
 0x139   :  { %v1218_v48 = vadd.f32 %v1217_v45, %v1216_v43  ;;  %v1239_v49 = vpop.f32.mrf.mxu1 }
 0x13a   :  { %v1219_v50 = vpop.f32.mrf.mxu0  ;;  %v1240_v56 = vadd.f32 %v1239_v49, %v1238_v44 }
 0x13b   :  { %v767_v52 = vadd.f32 %v1218_v48, %v726_v46  ;;  %v1241_v53 = vpop.f32.mrf.mxu1 }
 0x13c   :  { %v1220_v54 = vpop.f32.mrf.mxu0 }
 0x13d   :  { %v1221_v57 = vadd.f32 %v1220_v54, %v1219_v50  ;;  %v1242_v58 = vpop.f32.mrf.mxu1  ;;  %v808_v59 = vadd.f32 %v1240_v56, %v767_v52 }
 0x13e   :  { %v1243_v61 = vadd.f32 %v1242_v58, %v1241_v53 }
 0x13f   :  { %v770_v60 = vadd.f32 %v1221_v57, %v729_v55  ;;  %v814_v63 = vmax.f32 %v808_v59, 0.0 }
 0x141   :  { %v811_v62 = vadd.f32 %v1243_v61, %v770_v60 }
 0x143   :  { %v815_v0 = vmax.f32 %v811_v62, 0.0 }
 0x145   :  { %v816_v1 = vpack.c.bf16 %v815_v0, %v814_v63 }
 0x147   :  { %1279 = vmatmul.mubr.bf16.vlgmr.msra.gmra.mxu0 %v816_v1 }
 0x207   :  { %v922_v6 = vpop.f32.mrf.mxu0 }
 0x208   :  { %v923_v8 = vadd.f32 %v1138_v5, %v922_v6 }
 0x209   :  { %v1280_v7 = vpop.f32.mrf.mxu0 }
 0x20a   :  { %v929_v12 = vmax.f32 %v923_v8, 0.0 }
 0x20b   :  { %v925_v9 = vpop.f32.mrf.mxu0 }
 0x20c   :  { %v926_v10 = vadd.f32 %v1138_v5, %v925_v9 }
 0x20d   :  { %v1281_v11 = vpop.f32.mrf.mxu0 }
 0x20e   :  { %v930_v13 = vmax.f32 %v926_v10, 0.0 }
 0x210   :  { %v931_v14 = vpack.c.bf16 %v930_v13, %v929_v12 }
 0x212   :  { %1299 = vmatmul.mubr.bf16.vlgmr.msra.gmra.mxu1 %v931_v14 }
 0x2d2   :  { %v1037_v16 = vpop.f32.mrf.mxu1 }
 0x2d3   :  { %v1038_v17 = vadd.f32 %v1147_v15, %v1037_v16 }
 0x2d4   :  { %v1300_v18 = vpop.f32.mrf.mxu1 }
 0x2d5   :  { %1044 = vst [vmem:[#allocation10] sm:$0xff] %v1038_v17 }
 0x2d6   :  { %v1040_v19 = vpop.f32.mrf.mxu1 }
 0x2d7   :  { %v1041_v20 = vadd.f32 %v1147_v15, %v1040_v19 }
 0x2d8   :  { %v1301_v21 = vpop.f32.mrf.mxu1 }
 0x2d9   :  { %1045 = vst [vmem:[#allocation10 + $0x8] sm:$0xff] %v1041_v20 }
 0x2da   :  { %1486 = shalt.err (!%p1483_p10)
}
 0x2db   :  { %s1514_s28 = smov 128   ;;  %s1515_s6 = smov 8  }
 0x2dc   :  { %1057 = dma.vmem_to_hbm [thread:$0]  %s1052_s27, 256, %s1614_s7, [#allocation4], %s1514_s28, %s1514_s28, %s1515_s6  }
 0x2dd   :  { %1501 = dma.done.wait [#allocation4], 256  }
 0x2de   :  { %1502 = vsyncadd [#allocation4], 4294967040 }
 0x2df   :  { %1061 = vsyncpa [#allocation3], 1 }
 0x2e0   :  { %1062 = vsyncpa [#allocation6], 1 }
 0x2e1   :  { %1063 = vsyncpa [#allocation9], 1 }
 0x2e2   :  { %1064 = vsyncpa [#allocation4], 1 }

</bundles_post_ra>
